<compile_context>
chip_gen: v6e
topology: v6e:2x2x1
jax: 0.10.0
libtpu: 0.0.40
codegen_flags: <defaults>
</compile_context>

<pallas_src>
import functools

import jax
import jax.numpy as jnp
from jax.experimental import pallas as pl
from jax.experimental.pallas import tpu as pltpu

EPS = 1e-6  # timm ViT uses nn.LayerNorm(eps=1e-6)

# embed / head kernels are tiny -> default-safe 32 MiB.
_VMEM_LIMIT = 32 * 1024 * 1024
# block kernel: per-batch activations + resident weights; 48 MiB gives v6e
# headroom above the 32 MiB scoped default while staying under v7x's 64 MiB
# physical VMEM.
_VMEM_LIMIT_BLOCK = 48 * 1024 * 1024


def _layernorm(x, w, b):
    # x: (M, D) f32, w/b: (1, D) f32
    mu = jnp.mean(x, axis=-1, keepdims=True)
    var = jnp.mean(jnp.square(x - mu), axis=-1, keepdims=True)
    return (x - mu) * jax.lax.rsqrt(var + EPS) * w + b


# ---------------------------------------------------------------------------
# 1) embedding kernel (per-batch grid step): patch matmul + pos-embed (bias
#    pre-folded) + [cls+pos0 | prompt | patches] assembly as one dense store.
#    NOTE: prompt tokens get no positional embedding -- matches the reference
#    (pos_embed is added before the prompt is inserted).
# ---------------------------------------------------------------------------
def embed_kernel(p_ref, w_ref, prefix_ref, pos_patch_ref, o_ref):
    # p_ref: (1, N, Cpp) / w_ref: (Cpp, D) / prefix_ref: (1+P, D)
    # pos_patch_ref: (N, D) (= pos_embed[1:] + patch_bias, folded at init)
    tok = (jnp.dot(p_ref[0].astype(jnp.bfloat16), w_ref[...],
                   preferred_element_type=jnp.float32)
           + pos_patch_ref[...])                                # (N, D) f32
    o_ref[0] = jnp.concatenate([prefix_ref[...], tok], axis=0)  # (S, D) dense


def embed_tokens(patches, params, B, N, P):
    Cpp = patches.shape[-1]
    D = params['patch_w'].shape[1]
    S = 1 + P + N
    return pl.pallas_call(
        embed_kernel,
        grid=(B,),
        in_specs=[
            pl.BlockSpec((1, N, Cpp), lambda b: (b, 0, 0)),
            pl.BlockSpec((Cpp, D), lambda b: (0, 0)),
            pl.BlockSpec((1 + P, D), lambda b: (0, 0)),
            pl.BlockSpec((N, D), lambda b: (0, 0)),
        ],
        out_specs=pl.BlockSpec((1, S, D), lambda b: (b, 0, 0)),
        out_shape=jax.ShapeDtypeStruct((B, S, D), jnp.float32),
        compiler_params=pltpu.CompilerParams(
            dimension_semantics=("parallel",),
            vmem_limit_bytes=_VMEM_LIMIT),
    )(patches, params['patch_w'], params['prefix'], params['pos_patch'])


# ---------------------------------------------------------------------------
# 2) transformer block (timm Block: pre-norm MHSA + MLP), one batch per step
# ---------------------------------------------------------------------------
def block_kernel(num_heads, x_ref, ln1w, ln1b, qkvw, qkvb, projw, projb,
                 ln2w, ln2b, fc1w, fc1b, fc2w, fc2b, o_ref):
    _, S, D = x_ref.shape
    H = num_heads
    hd = D // H

    x = x_ref[0]                                                # (S, D) f32

    # --- attention branch ---
    xn = _layernorm(x, ln1w[...], ln1b[...])
    qkv = (jnp.dot(xn.astype(jnp.bfloat16), qkvw[...],
                   preferred_element_type=jnp.float32)
           + qkvb[...])                                         # (S, 3D) f32

    def split_heads(t2d):
        # 128-lane-aligned (S, D) slice -> single relayout to (H, S, hd)
        return jnp.swapaxes(t2d.reshape(S, H, hd), 0, 1).astype(jnp.bfloat16)

    q = split_heads(qkv[:, 0:D])     # scale pre-folded into qkv q-columns
    k = split_heads(qkv[:, D:2 * D])
    v = split_heads(qkv[:, 2 * D:3 * D])

    s = jnp.einsum('hqd,hkd->hqk', q, k,
                   preferred_element_type=jnp.float32)          # (H, S, S) f32
    s = s - jnp.max(s, axis=-1, keepdims=True)
    p = jnp.exp(s)
    p = p * pl.reciprocal(jnp.sum(p, axis=-1, keepdims=True), approx=True)
    o = jnp.einsum('hqk,hkd->hqd', p.astype(jnp.bfloat16), v,
                   preferred_element_type=jnp.float32)          # (H, S, hd) f32

    # head merge: single relayout back to a lane-dense (S, D) slab
    attn = jnp.swapaxes(o, 0, 1).reshape(S, D)
    attn = (jnp.dot(attn.astype(jnp.bfloat16), projw[...],
                    preferred_element_type=jnp.float32)
            + projb[...])
    x = x + attn

    # --- MLP branch ---
    xn2 = _layernorm(x, ln2w[...], ln2b[...])
    h1 = (jnp.dot(xn2.astype(jnp.bfloat16), fc1w[...],
                  preferred_element_type=jnp.float32)
          + fc1b[...])
    h1 = jax.nn.gelu(h1, approximate=False)   # exact GELU (matches nn.GELU())
    h2 = (jnp.dot(h1.astype(jnp.bfloat16), fc2w[...],
                  preferred_element_type=jnp.float32)
          + fc2b[...])
    o_ref[0] = x + h2


def run_block(x, blk, num_heads):
    B, S, D = x.shape
    hid = blk['fc1_w'].shape[1]
    hd = D // num_heads
    ws = [blk['ln1_w'], blk['ln1_b'], blk['qkv_w'], blk['qkv_b'],
          blk['proj_w'], blk['proj_b'], blk['ln2_w'], blk['ln2_b'],
          blk['fc1_w'], blk['fc1_b'], blk['fc2_w'], blk['fc2_b']]

    # weights: full-array blocks with a constant index_map -> VMEM-resident
    # across grid steps (no re-fetch).
    w_specs = [pl.BlockSpec(a.shape, lambda b: (0, 0)) for a in ws]

    flops = (2 * B * S * D * (3 * D + D + 2 * hid)          # qkv/proj/fc1/fc2
             + 4 * B * num_heads * S * S * hd)              # qk^T and pv
    transcendentals = B * num_heads * S * S + B * S * hid   # softmax exp + gelu
    bytes_accessed = (2 * B * S * D * 4
                      + sum(int(a.size) * a.dtype.itemsize for a in ws))

    return pl.pallas_call(
        functools.partial(block_kernel, num_heads),
        grid=(B,),
        in_specs=[pl.BlockSpec((1, S, D), lambda b: (b, 0, 0))] + w_specs,
        out_specs=pl.BlockSpec((1, S, D), lambda b: (b, 0, 0)),
        out_shape=jax.ShapeDtypeStruct((B, S, D), jnp.float32),
        cost_estimate=pl.CostEstimate(flops=flops,
                                      transcendentals=transcendentals,
                                      bytes_accessed=bytes_accessed),
        compiler_params=pltpu.CompilerParams(
            dimension_semantics=("parallel",),
            vmem_limit_bytes=_VMEM_LIMIT_BLOCK),
    )(x, *ws)


# ---------------------------------------------------------------------------
# 3) head: final LayerNorm on CLS, shallow adapter residual, unified classifier
#    (classifier weight pre-padded so the output lane dim is 128-dense)
# ---------------------------------------------------------------------------
def head_kernel(apply_adapter, cls_ref, nw, nb, dw, db, uw, ub, cw, cb, o_ref):
    feat = _layernorm(cls_ref[...], nw[...], nb[...])
    if apply_adapter:   # static (numtask > 1)
        mid = (jnp.dot(feat.astype(jnp.bfloat16), dw[...],
                       preferred_element_type=jnp.float32) + db[...])
        delta = (jnp.dot(mid.astype(jnp.bfloat16), uw[...],
                         preferred_element_type=jnp.float32) + ub[...])
        feat = feat + delta
    o_ref[...] = (jnp.dot(feat.astype(jnp.bfloat16), cw[...],
                          preferred_element_type=jnp.float32) + cb[...])


def run_head(cls_tok, params, apply_adapter):
    B, _ = cls_tok.shape
    Cpad = params['clf_w'].shape[1]
    return pl.pallas_call(
        functools.partial(head_kernel, apply_adapter),
        out_shape=jax.ShapeDtypeStruct((B, Cpad), jnp.float32),
        compiler_params=pltpu.CompilerParams(vmem_limit_bytes=_VMEM_LIMIT),
    )(cls_tok, params['norm_w'], params['norm_b'],
      params['down_w'], params['down_b'],
      params['up_w'], params['up_b'],
      params['clf_w'], params['clf_b'])


# ---------------------------------------------------------------------------
# full forward (pina_vit.forward, ca_mode='shallow')
# ---------------------------------------------------------------------------
def pina_vit_forward(image, params, cfg):
    B, C, H, W = image.shape
    p = cfg['patch']
    hp, wp = H // p, W // p
    N = hp * wp
    P = cfg['prompt_len']

    # patchify NCHW with (c, ph, pw) kernel ordering == PyTorch Conv2d layout
    patches = (image.reshape(B, C, hp, p, wp, p)
                    .transpose(0, 2, 4, 1, 3, 5)
                    .reshape(B, N, C * p * p))

    # fused: patch-embed matmul + pos-embed + [cls | prompt | patches]
    x = embed_tokens(patches, params, B, N, P)     # (B, 1+P+N, D)

    for blk in params['blocks']:
        x = run_block(x, blk, cfg['num_heads'])

    cls_tok = x[:, 0]                                          # (B, D)
    logits = run_head(cls_tok, params, apply_adapter=cfg['numtask'] > 1)
    return {'logits': logits[:, :cfg['class_num']]}


# ---------------------------------------------------------------------------
# deterministic parameter init (synthetic -- mirrors module __init__ shapes).
# One-time prep transforms folded in here: weight transpose to (in, out),
# bf16 cast of matmul weights, attention scale folded into q columns,
# patch bias folded into pos-embed patch rows, cls+pos0/prompt prefix slab,
# classifier lane-padding to a multiple of 128.
# ---------------------------------------------------------------------------
def init_params(key, cfg):
    D = cfg['embed_dim']
    p = cfg['patch']
    C = cfg['in_chans']
    N = (cfg['img'] // p) ** 2
    hid_mlp = int(D * cfg['mlp_ratio'])
    hid = cfg['hidden_dim']
    hd = D // cfg['num_heads']
    scale = hd ** -0.5

    keys = iter(jax.random.split(key, 256))

    def w(shape, scl=0.02):
        return scl * jax.random.normal(next(keys), shape, jnp.float32)

    params = {}
    conv_w = w((D, C, p, p))                       # PyTorch conv weight (D,C,p,p)
    params['patch_w'] = conv_w.reshape(D, C * p * p).T.astype(jnp.bfloat16)
    patch_b = w((D,))
    cls_token = w((1, 1, D)).reshape(1, D)
    pos_embed = w((1, 1 + N, D)).reshape(1 + N, D)

    blocks = []
    for _ in range(cfg['depth']):
        qkv_w = w((3 * D, D)).T                    # (D, 3D)
        qkv_b = w((3 * D,)).reshape(1, 3 * D)
        # fold attention scale into the query columns (one-time transform)
        qkv_w = qkv_w.at[:, :D].multiply(scale)
        qkv_b = qkv_b.at[:, :D].multiply(scale)
        blocks.append({
            'ln1_w': jnp.ones((1, D), jnp.float32),
            'ln1_b': jnp.zeros((1, D), jnp.float32),
            'qkv_w': qkv_w.astype(jnp.bfloat16), 'qkv_b': qkv_b,
            'proj_w': w((D, D)).T.astype(jnp.bfloat16),
            'proj_b': w((D,)).reshape(1, D),
            'ln2_w': jnp.ones((1, D), jnp.float32),
            'ln2_b': jnp.zeros((1, D), jnp.float32),
            'fc1_w': w((hid_mlp, D)).T.astype(jnp.bfloat16),
            'fc1_b': w((hid_mlp,)).reshape(1, hid_mlp),
            'fc2_w': w((D, hid_mlp)).T.astype(jnp.bfloat16),
            'fc2_b': w((D,)).reshape(1, D),
        })
    params['blocks'] = blocks
    params['norm_w'] = jnp.ones((1, D), jnp.float32)
    params['norm_b'] = jnp.zeros((1, D), jnp.float32)

    # prompt_pool[numtask - 1].weight : (prompt_length, image_dim)
    prompt_pool = [w((cfg['prompt_len'], D)) for _ in range(cfg['total_sessions'])]
    prompt = prompt_pool[cfg['numtask'] - 1]

    # init-time folds for the embed kernel:
    #   pos_patch = pos_embed[1:] + patch_bias   (patch rows)
    #   prefix    = [cls + pos0 ; prompt]        (prompt gets no pos-embed,
    #                                             matching the reference order)
    params['pos_patch'] = pos_embed[1:] + patch_b[None, :]
    params['prefix'] = jnp.concatenate([cls_token + pos_embed[0:1], prompt], axis=0)

    sess = cfg['numtask'] - 1
    if sess == 0:   # session 0 adapters are zero-initialized
        params['down_w'] = jnp.zeros((D, hid), jnp.bfloat16)
        params['down_b'] = jnp.zeros((1, hid), jnp.float32)
        params['up_w'] = jnp.zeros((hid, D), jnp.bfloat16)
        params['up_b'] = jnp.zeros((1, D), jnp.float32)
    else:           # xavier-style weights, zero bias
        params['down_w'] = w((hid, D)).T.astype(jnp.bfloat16)
        params['down_b'] = jnp.zeros((1, hid), jnp.float32)
        params['up_w'] = w((D, hid)).T.astype(jnp.bfloat16)
        params['up_b'] = jnp.zeros((1, D), jnp.float32)

    # unified classifier, lane-padded to a multiple of 128 output columns
    Cn = cfg['class_num']
    Cpad = ((Cn + 127) // 128) * 128
    clf_w = w((Cn, D)).T                           # (D, Cn)
    clf_b = w((Cn,))
    params['clf_w'] = (jnp.zeros((D, Cpad), jnp.float32)
                       .at[:, :Cn].set(clf_w).astype(jnp.bfloat16))
    params['clf_b'] = jnp.zeros((1, Cpad), jnp.float32).at[:, :Cn].set(clf_b)
    return params


if __name__ == "__main__":
    cfg = dict(
        img=32, patch=16, in_chans=3,          # 4 patches
        embed_dim=128, depth=2, num_heads=4, mlp_ratio=4.0,
        prompt_len=3,                          # S = 1 + 3 + 4 = 8 tokens
        hidden_dim=16, total_sessions=3,
        class_num=2,                           # dataset = 'cddb'
        numtask=2,                             # exercises shallow adapter path
    )
    key = jax.random.PRNGKey(0)
    k_param, k_img = jax.random.split(key)
    params = init_params(k_param, cfg)
    image = jax.random.normal(k_img, (2, cfg['in_chans'], cfg['img'], cfg['img']),
                              jnp.float32)

    out = pina_vit_forward(image, params, cfg)
    logits = jax.block_until_ready(out['logits'])
    assert logits.shape == (2, cfg['class_num'])
    assert bool(jnp.all(jnp.isfinite(logits)))
    print("KERNEL_OK")
</pallas_src>

<mosaic_0001>
module attributes {stable_mosaic.version = 11 : i64} {
  func.func @embed_kernel(%arg0: i32, %arg1: memref<1x4x768xf32, #tpu.memory_space<vmem>>, %arg2: memref<768x128xbf16, #tpu.memory_space<vmem>>, %arg3: memref<4x128xf32, #tpu.memory_space<vmem>>, %arg4: memref<4x128xf32, #tpu.memory_space<vmem>>, %arg5: memref<1x8x128xf32, #tpu.memory_space<vmem>>) attributes {dimension_semantics = [#tpu.dimension_semantics<parallel>], iteration_bounds = array<i64: 2>, scalar_prefetch = 0 : i64, scratch_operands = 0 : i64, tpu.core_type = #tpu.core_type<tc>, window_params = [{transform_indices = @transform_0, window_bounds = array<i64: 1, 4, 768>}, {pipeline_mode = #tpu.pipeline_mode<synchronous>, transform_indices = @transform_1, window_bounds = array<i64: 768, 128>}, {pipeline_mode = #tpu.pipeline_mode<synchronous>, transform_indices = @transform_2, window_bounds = array<i64: 4, 128>}, {pipeline_mode = #tpu.pipeline_mode<synchronous>, transform_indices = @transform_3, window_bounds = array<i64: 4, 128>}, {transform_indices = @transform_4, window_bounds = array<i64: 1, 8, 128>}]} {
    %c0 = arith.constant 0 : index
    %c0_0 = arith.constant 0 : index
    %c0_1 = arith.constant 0 : index
    %0 = vector.load %arg1[%c0, %c0_0, %c0_1] : memref<1x4x768xf32, #tpu.memory_space<vmem>>, vector<1x4x768xf32>
    %1 = vector.shape_cast %0 : vector<1x4x768xf32> to vector<4x768xf32>
    %2 = arith.truncf %1 : vector<4x768xf32> to vector<4x768xbf16>
    %c0_2 = arith.constant 0 : index
    %c0_3 = arith.constant 0 : index
    %3 = vector.load %arg2[%c0_2, %c0_3] : memref<768x128xbf16, #tpu.memory_space<vmem>>, vector<768x128xbf16>
    %cst = arith.constant dense<0.000000e+00> : vector<4x128xf32>
    %4 = tpu.matmul %2, %3, %cst {dimension_numbers = #tpu.dot_dimension_numbers<[1], [0], [0], [1], [0, 0, 1, 1], [], []>} : vector<4x768xbf16>, vector<768x128xbf16>, vector<4x128xf32> -> vector<4x128xf32>
    %c0_4 = arith.constant 0 : index
    %c0_5 = arith.constant 0 : index
    %5 = vector.load %arg4[%c0_4, %c0_5] : memref<4x128xf32, #tpu.memory_space<vmem>>, vector<4x128xf32>
    %6 = arith.addf %4, %5 : vector<4x128xf32>
    %c0_6 = arith.constant 0 : index
    %c0_7 = arith.constant 0 : index
    %7 = vector.load %arg3[%c0_6, %c0_7] : memref<4x128xf32, #tpu.memory_space<vmem>>, vector<4x128xf32>
    %8 = tpu.concatenate %7, %6 in 0 : vector<4x128xf32>, vector<4x128xf32> -> vector<8x128xf32>
    %c0_8 = arith.constant 0 : index
    %c0_9 = arith.constant 0 : index
    %c0_10 = arith.constant 0 : index
    %9 = vector.load %arg5[%c0_8, %c0_9, %c0_10] : memref<1x8x128xf32, #tpu.memory_space<vmem>>, vector<1x8x128xf32>
    %10 = vector.shape_cast %9 : vector<1x8x128xf32> to vector<8x128xf32>
    %11 = vector.shape_cast %8 : vector<8x128xf32> to vector<1x8x128xf32>
    tpu.vector_store %arg5[%c0_8, %c0_9, %c0_10], %11 {strides = array<i32>} : memref<1x8x128xf32, #tpu.memory_space<vmem>>, vector<1x8x128xf32>,
    return
  }
  func.func @transform_0(%arg0: i32) -> (i32, i32, i32) {
    %c0_i32 = arith.constant 0 : i32
    %c0_i32_0 = arith.constant 0 : i32
    %c0_i32_1 = arith.constant 0 : i32
    return %arg0, %c0_i32, %c0_i32_0 : i32, i32, i32
  }
  func.func @transform_1(%arg0: i32) -> (i32, i32) {
    %c0_i32 = arith.constant 0 : i32
    %c0_i32_0 = arith.constant 0 : i32
    %c0_i32_1 = arith.constant 0 : i32
    return %c0_i32, %c0_i32_0 : i32, i32
  }
  func.func @transform_2(%arg0: i32) -> (i32, i32) {
    %c0_i32 = arith.constant 0 : i32
    %c0_i32_0 = arith.constant 0 : i32
    %c0_i32_1 = arith.constant 0 : i32
    return %c0_i32, %c0_i32_0 : i32, i32
  }
  func.func @transform_3(%arg0: i32) -> (i32, i32) {
    %c0_i32 = arith.constant 0 : i32
    %c0_i32_0 = arith.constant 0 : i32
    %c0_i32_1 = arith.constant 0 : i32
    return %c0_i32, %c0_i32_0 : i32, i32
  }
  func.func @transform_4(%arg0: i32) -> (i32, i32, i32) {
    %c0_i32 = arith.constant 0 : i32
    %c0_i32_0 = arith.constant 0 : i32
    %c0_i32_1 = arith.constant 0 : i32
    return %arg0, %c0_i32, %c0_i32_0 : i32, i32, i32
  }
}

</mosaic_0001>

<bundles_post_ra>
// kernel: tpu_custom_call.1
= control target key start
LH: loop header
LB: loop body
LE: loop exit
PB: predicated region body
PF: predicated region fallthrough
CT: control target
= control target key end

     0   :  { %9 = vsyncpa [#allocation3], 0  ;;  %s1487_s0 = inlined_call_operand.hbm [shape: f32[2,4,768], index: 0, kind: input, shape index: {}]   ;;  %s1488_s1 = inlined_call_operand.hbm [shape: bf16[768,128], index: 1, kind: input, shape index: {}]   ;;  %s1489_s2 = inlined_call_operand.hbm [shape: f32[4,128], index: 2, kind: input, shape index: {}]   ;;  %s1490_s3 = inlined_call_operand.vmem [shape: f32[4,128], index: 3, kind: input, shape index: {}]   ;;  %s1491_s4 = inlined_call_operand.hbm [shape: f32[2,8,128], index: 4, kind: output, shape index: {}]  }
   0x1   :  { %11 = vsyncpa [#allocation3 + $0x1], 0 }
   0x2   :  { %12 = vsyncpa [#allocation6], 0 }
   0x3   :  { %13 = vsyncpa [#allocation4], 0 }
   0x4   :  { %15 = vsyncpa [#allocation4 + $0x1], 0  ;;  %s1307_s15 = smov 0   ;;  %s1309_s16 = smov 0  }
   0x5   :  { %s1311_s17 = smov 0   ;;  %s1313_s18 = smov 0  }
   0x6 LB: > { %s1328_s19 = sadd.s32 4294967295, %s1274_s18   ;;  %s875_s20 = sadd.s32 4294967294, %s1274_s18   ;;  %s1274_s18 = sphi %s1313_s18, %s1513_s18   ;;  %s1270_s17 = sphi %s1311_s17, %s1512_s17   ;;  %s1266_s16 = sphi %s1309_s16, %s1511_s16   ;;  %s1262_s15 = sphi %s1307_s15, %s1510_s15  }
   0x7   : > { %p41_p0 = scmp.ne.s32.totalorder %s1266_s16, %s1262_s15  ;;  %p1492_p1 = scmp.eq.s32.totalorder %s1328_s19, 0 }
   0x8   : > { %p134_p3 = scmp.eq.s32.totalorder %s875_s20, 1  ;;  %p876_p5 = scmp.ge.s32.totalorder %s1274_s18, 1 }
   0x9   : > { %p1337_p4 = por %p1492_p1, %p41_p0  ;;  %p141_p7 = scmp.lt.s32.totalorder %s1274_s18, 3 }
   0xa   : > { %p1342_p6 = por %p134_p3, %p41_p0  ;;  %s1276_s24 = smov [#allocation5]  }
   0xb   : > { %s1496_s21 = scalar_select %p1337_p4, 1, 0 }
   0xc   : > { %s1497_s22 = scalar_select %p1342_p6, 1, 0 }
   0xd   : > { %p1347_p8 = pnand %p876_p5, %p141_p7  ;;  %s153_s25 = sshll.u32 %s1276_s24, 4  ;;  %s154_s25 = int_to_ptr.vmem [resolvable:$true] %s153_s25 }
   0xe   : > { %s1277_s27 = smov [#allocation7]   ;;  %s1137_s29 = scalar_lea.vmem %s154_s25, 6144 }
   0xf   : > { %s1498_s23 = scalar_select %p1347_p8, 1, 0 }
  0x10   : > { %p1018_p9 = pneg %p1347_p8  ;;  %s167_s28 = sshll.u32 %s1277_s27, 4  ;;  %s168_s28 = int_to_ptr.vmem [resolvable:$true] %s167_s28 }
  0x11   : > { %p1138_p13 = scmp.ne.s32.totalorder %s154_s25, %s1137_s29  ;;  %p1145_p5 = scmp.lt.s32.totalorder %s154_s25, %s154_s25 }
  0x12   : > { %p1356_p11 = pnand %p1018_p9, %p1492_p1  ;;  %p1146_p7 = scmp.lt.s32.totalorder %s1137_s29, %s1137_s29 }
  0x14   : > { %p1128_p12 = pneg %p1356_p11  ;;  %p1147_p10 = por %p1146_p7, %p1145_p5 }
  0x16   : > { %p1140_p0 = pnand %p1138_p13, %p1128_p12 }
  0x18   : > { %p1141_p3 = pneg %p1140_p0 }
  0x1a   : > { %p1148_p9 = pnand %p1147_p10, %p1141_p3 }
  0x1c   : > { %1151 = shalt.err (!%p1148_p9)
}
  0x1d   : > { %s1278_s30 = smov 64   ;;  %s1279_s5 = smov 4  }
  0x1e   : > { %1021 = dma.hbm_to_vmem [thread:$0]  (!%p1356_p11), %s1488_s1, 6144, %s154_s25, [#allocation6], %s1278_s30, %s1278_s30, %s1279_s5  }
  0x1f   : > { %s1163_s8 = scalar_lea.vmem %s168_s28, 64  ;;  %p1171_p2 = scmp.lt.s32.totalorder %s168_s28, %s168_s28 }
  0x20   : > { %p1164_p1 = scmp.ne.s32.totalorder %s168_s28, %s1163_s8  ;;  %p1172_p6 = scmp.lt.s32.totalorder %s1163_s8, %s1163_s8 }
  0x22   : > { %p1166_p13 = pnand %p1164_p1, %p1128_p12  ;;  %p1173_p5 = por %p1172_p6, %p1171_p2 }
  0x24   : > { %p1167_p0 = pneg %p1166_p13 }
  0x26   : > { %p1174_p10 = pnand %p1173_p5, %p1167_p0 }
  0x28   : > { %1177 = shalt.err (!%p1174_p10)
}
  0x29   : > { %1024 = dma.hbm_to_vmem [thread:$0]  (!%p1356_p11), %s1489_s2, 64, %s168_s28, [#allocation6]  }
  0x2a   : > { %s1379_s11 = sadd.s32 1, %s1274_s18   ;;  %s28_s12 = sadd.s32 1, %s1270_s17 }
  0x2b   : > { %s25_s13 = ssub.s32 %s1274_s18, %s1379_s11  ;;  %p35_p1 = scmp.ne.s32.totalorder %s1270_s17, %s1266_s16 }
  0x2c   : > { %p26_p2 = scmp.eq.s32.totalorder %s25_s13, 0  ;;  %p36_p6 = scmp.eq.s32.totalorder %s1274_s18, 0 }
  0x2d   : > { %p1500_p12 = scmp.eq.s32.totalorder %s1328_s19, 1  ;;  %p1035_p7 = scmp.lt.s32.totalorder %s1274_s18, 2 }
  0x2e   : > { %s1395_s20 = scalar_select %p26_p2, %s1270_s17, %s28_s12  }
  0x2f   : > { %p1389_p3 = por %p1500_p12, %p35_p1  ;;  %p37_p9 = por %p36_p6, %p35_p1 }
  0x30   : > { %s181_s24 = sand.u32 1, %s1270_s17   ;;  %s1004_s26 = smul.u32 384, %s1274_s18 }
  0x31   : > { %s1501_s14 = scalar_select %p1389_p3, 1, 0 }
  0x32   : > { %s1003_s25 = smul.u32 24, %s181_s24  ;;  %p1399_p11 = pnand %p1035_p7, %p37_p9 }
  0x33   : > { %s1406_s30 = scalar_lea.hbm %s1487_s0, %s1004_s26  ;;  %s182_s7 = scalar_lea.sflag [#allocation3], %s181_s24 }
  0x34   : > { %s185_s5 = scalar_lea.vmem [#allocation2], %s1003_s25  ;;  %s1178_s8 = scalar_lea.hbm %s1406_s30, 384 }
  0x35   : > { %s193_s6 = sshll.u32 %s185_s5, 4  ;;  %p1179_p13 = scmp.ne.s32.totalorder %s1406_s30, %s1178_s8  ;;  %s194_s6 = int_to_ptr.vmem [resolvable:$true] %s193_s6 }
  0x36   : > { %p1180_p0 = pneg %p1399_p11  ;;  %s1183_s12 = scalar_lea.hbm %s1487_s0, 768 }
  0x37   : > { %p1184_p1 = scmp.lt.s32.totalorder %s1406_s30, %s1487_s0  ;;  %p1185_p2 = scmp.lt.s32.totalorder %s1183_s12, %s1178_s8 }
  0x38   : > { %p1181_p5 = pnand %p1180_p0, %p1179_p13 }
  0x39   : > { %p1186_p6 = por %p1185_p2, %p1184_p1 }
  0x3a   : > { %p1182_p10 = pneg %p1181_p5 }
  0x3c   : > { %p1187_p12 = pnand %p1186_p6, %p1182_p10 }
  0x3e   : > { %1190 = shalt.err (!%p1187_p12)
}
  0x3f   : > { %s1191_s25 = scalar_lea.vmem %s194_s6, 384  ;;  %s1280_s24 = smov [#allocation2]  }
  0x40   : > { %p1192_p7 = scmp.ne.s32.totalorder %s194_s6, %s1191_s25  ;;  %s1196_s28 = sshll.u32 %s1280_s24, 4  ;;  %s1197_s28 = int_to_ptr.vmem [resolvable:$false] %s1196_s28 }
  0x41   : > { %s1198_s29 = scalar_lea.vmem %s1197_s28, 768  ;;  %p1199_p13 = scmp.lt.s32.totalorder %s194_s6, %s1197_s28 }
  0x42   : > { %p1194_p9 = pnand %p1192_p7, %p1180_p0  ;;  %p1200_p5 = scmp.lt.s32.totalorder %s1198_s29, %s1191_s25 }
  0x44   : > { %p1195_p3 = pneg %p1194_p9  ;;  %p1201_p4 = por %p1200_p5, %p1199_p13 }
  0x46   : > { %p1202_p8 = pnand %p1201_p4, %p1195_p3 }
  0x48   : > { %1205 = shalt.err (!%p1202_p8)
}
  0x49   : > { %1028 = dma.hbm_to_vmem [thread:$0]  (!%p1399_p11), %s1406_s30, 384, %s194_s6, %s182_s7  }
  0x4a   : > { %p1503_p10 = scmp.ne.s32.totalorder %s1498_s23, 0 }
  0x4b   : > { %s1425_s5 = sand.u32 (!%p1503_p10), 1, %s1266_s16   ;;  %p1504_p0 = scmp.ne.s32.totalorder (!%p1503_p10), %s1496_s21, 0 }
  0x4c   : > { %202 = sbr.rel (%p1503_p10) target bundleno = 365 (0x16d), region = 36  ;;  %s205_s9 = scalar_lea.sflag (!%p1503_p10), [#allocation3], %s1425_s5 }
  0x4d   : > { %s1005_s8 = smul.u32 (!%p1503_p10), 24, %s1425_s5 }
  0x4f   : > { %s1429_s10 = scalar_lea.vmem (!%p1503_p10), [#allocation2], %s1005_s8 }
  0x51   : > { %1249 = dma.done.wait (%p1504_p0), %s205_s9, 384  }
  0x52   : > { %1251 = vsyncadd (%p1504_p0), %s205_s9, 4294966912  ;;  %p1505_p4 = scmp.eq.s32.totalorder %s1328_s19, 0 }
  0x54   : > { %1253 = dma.done.wait (%p1505_p4), [#allocation6], 6208   ;;  %p1506_p8 = pmov %p1505_p4 }
  0x55   : > { %v1075_v0 = vld [vmem:[#allocation5 + $0x78] sm:$0xff]   ;;  %v1079_v4 = vld [vmem:[#allocation5 + $0x70] sm:$0xff]   ;;  %v1083_v8 = vld [vmem:[#allocation5 + $0x68] sm:$0xff]   ;;  %s884_s27 = sshll.u32 %s1425_s5, 3  ;;  %s934_s30 = sshll.u32 %s1328_s19, 7  ;;  %vm769_vm0 = vcmask 1043456  }
  0x56   : > { %1255 = vsyncadd (%p1506_p8), [#allocation6], 4294961088  ;;  %v1076_v1 = vld [vmem:[#allocation5 + $0x38] sm:$0xff]   ;;  %937 = vmatprep.subr.bf16.mxu0 %v1075_v0  ;;  %v1080_v5 = vld [vmem:[#allocation5 + $0x30] sm:$0xff]   ;;  %s240_s6 = scalar_lea.vmem [#allocation8], %s884_s27  ;;  %s1450_s26 = scalar_lea.hbm %s1491_s4, %s934_s30 }
  0x57   : > { %v1077_v2 = vld [vmem:[#allocation5 + $0xf8] sm:$0xff]   ;;  %938 = vmatpush3.bf16.msra.mxu0 %v1076_v1  ;;  %v1081_v6 = vld [vmem:[#allocation5 + $0xf0] sm:$0xff]   ;;  %v1084_v9 = vld [vmem:[#allocation5 + $0x28] sm:$0xff]   ;;  %s786_s7 = sshll.u32 %s240_s6, 4  ;;  %s773_s25 = scalar_lea.sflag [#allocation4], %s1425_s5  ;;  %s787_s7 = int_to_ptr.vmem [resolvable:$true] %s786_s7 }
  0x58   : > { %v1078_v3 = vld [vmem:[#allocation5 + $0xb8] sm:$0xff]   ;;  %959 = vmatprep.subr.bf16.mxu1 %v1077_v2  ;;  %939 = vmatprep.subr.bf16.mxu0 %v1079_v4  ;;  %v1082_v7 = vld [vmem:[#allocation5 + $0xb0] sm:$0xff]   ;;  %v1085_v10 = vld [vmem:[#allocation5 + $0xe8] sm:$0xff]   ;;  %s1206_s24 = scalar_lea.vmem %s787_s7, 128  ;;  %p1507_p11 = scmp.ne.s32.totalorder %s1501_s14, 0 }
  0x59   : > { %960 = vmatpush3.bf16.msra.mxu1 %v1078_v3  ;;  %v1086_v11 = vld [vmem:[#allocation5 + $0xa8] sm:$0xff]   ;;  %v1087_v12 = vld [vmem:[#allocation5 + $0x60] sm:$0xff]   ;;  %v1091_v16 = vld [vmem:[#allocation5 + $0x58] sm:$0xff]   ;;  %p1207_p3 = scmp.ne.s32.totalorder %s787_s7, %s1206_s24  ;;  %s1281_s19 = smov [#allocation8]  }
  0x5a   : > { %961 = vmatprep.subr.bf16.mxu1 %v1081_v6  ;;  %v1088_v13 = vld [vmem:[#allocation5 + $0x20] sm:$0xff]   ;;  %v1092_v17 = vld [vmem:[#allocation5 + $0x18] sm:$0xff]   ;;  %v1095_v20 = vld [vmem:[#allocation5 + $0x50] sm:$0xff]   ;;  %s1210_s28 = sshll.u32 %s1281_s19, 4  ;;  %s1211_s28 = int_to_ptr.vmem [resolvable:$false] %s1210_s28 }
  0x5b   : > { %940 = vmatpush3.bf16.msra.mxu0 %v1080_v5  ;;  %v1089_v14 = vld [vmem:[#allocation5 + $0xe0] sm:$0xff]   ;;  %v1093_v18 = vld [vmem:[#allocation5 + $0xd8] sm:$0xff]   ;;  %v1096_v21 = vld [vmem:[#allocation5 + $0x10] sm:$0xff]   ;;  %p1208_p1 = pnand %p1207_p3, %p1507_p11  ;;  %s1212_s29 = scalar_lea.vmem %s1211_s28, 256 }
  0x5c   : > { %941 = vmatprep.subr.bf16.mxu0 %v1083_v8  ;;  %v1090_v15 = vld [vmem:[#allocation5 + $0xa0] sm:$0xff]   ;;  %v1094_v19 = vld [vmem:[#allocation5 + $0x98] sm:$0xff]   ;;  %v1097_v22 = vld [vmem:[#allocation5 + $0xd0] sm:$0xff]   ;;  %p1213_p6 = scmp.lt.s32.totalorder %s787_s7, %s1211_s28  ;;  %p1214_p12 = scmp.lt.s32.totalorder %s1212_s29, %s1206_s24 }
  0x5d   : > { %962 = vmatpush3.bf16.msra.mxu1 %v1082_v7  ;;  %v1098_v23 = vld [vmem:[#allocation5 + $0x90] sm:$0xff]   ;;  %v1099_v24 = vld [vmem:[#allocation5 + $0x48] sm:$0xff]   ;;  %v1103_v28 = vld [vmem:[#allocation5 + $0x40] sm:$0xff]   ;;  %p1209_p2 = pneg %p1208_p1 }
  0x5e   : > { %963 = vmatprep.subr.bf16.mxu1 %v1085_v10  ;;  %v1100_v25 = vld [vmem:[#allocation5 + $0x8] sm:$0xff]   ;;  %v1104_v29 = vld [vmem:[#allocation5] sm:$0xff]   ;;  %v1108_v35 = vld [vmem:[#allocation5 + $0x178] sm:$0xff]   ;;  %p1215_p7 = por %p1214_p12, %p1213_p6 }
  0x5f   : > { %942 = vmatpush3.bf16.msra.mxu0 %v1084_v9  ;;  %v1101_v26 = vld [vmem:[#allocation5 + $0xc8] sm:$0xff]   ;;  %v1105_v30 = vld [vmem:[#allocation5 + $0xc0] sm:$0xff]   ;;  %v243_v36 = vld [vmem:[%s1429_s10 + $0x8] sm:$0xff] }
  0x60   : > { %943 = vmatprep.subr.bf16.mxu0 %v1087_v12  ;;  %v1102_v27 = vld [vmem:[#allocation5 + $0x88] sm:$0xff]   ;;  %v1107_v33 = vld [vmem:[#allocation5 + $0x80] sm:$0xff]   ;;  %v249_v38 = vcombine.high %v243_v36, %v243_v36  ;;  %v1110_v39 = vld [vmem:[#allocation5 + $0x138] sm:$0xff]   ;;  %v256_v40 = vpack.c.bf16 %v243_v36, %v243_v36  ;;  %p1216_p9 = pnand %p1215_p7, %p1209_p2 }
  0x61   : > { %964 = vmatpush3.bf16.msra.mxu1 %v1086_v11  ;;  %v242_v31 = vld [vmem:[%s1429_s10] sm:$0xff]  ;;  %v1115_v46 = vld [vmem:[#allocation5 + $0x160] sm:$0xff]   ;;  %v1117_v48 = vld [vmem:[#allocation5 + $0x158] sm:$0xff]  }
  0x62   : > { %965 = vmatprep.subr.bf16.mxu1 %v1089_v14  ;;  %v248_v32 = vcombine.high %v242_v31, %v242_v31  ;;  %v254_v34 = vpack.c.bf16 %v242_v31, %v242_v31  ;;  %v1111_v41 = vld [vmem:[#allocation5 + $0x170] sm:$0xff]   ;;  %v257_v42 = vpack.c.bf16 %v249_v38, %v249_v38  ;;  %v1113_v44 = vld [vmem:[#allocation5 + $0x168] sm:$0xff]   ;;  %v1116_v47 = vld [vmem:[#allocation5 + $0x120] sm:$0xff]  }
  0x63   : > { %944 = vmatpush3.bf16.msra.mxu0 %v1088_v13  ;;  %v1112_v43 = vld [vmem:[#allocation5 + $0x130] sm:$0xff]   ;;  %v1114_v45 = vld [vmem:[#allocation5 + $0x128] sm:$0xff]   ;;  %v244_v49 = vld [vmem:[%s1429_s10 + $0x10] sm:$0xff] }
  0x64   : > { %945 = vmatprep.subr.bf16.mxu0 %v1091_v16  ;;  %v255_v37 = vpack.c.bf16 %v248_v32, %v248_v32  ;;  %717 = vmatprep.mubr.bf16.mxu1 %v257_v42  ;;  %v250_v50 = vcombine.high %v244_v49, %v244_v49  ;;  %v1118_v51 = vld [vmem:[#allocation5 + $0x118] sm:$0xff]   ;;  %v1119_v52 = vld [vmem:[#allocation5 + $0x150] sm:$0xff]   ;;  %v1121_v55 = vld [vmem:[#allocation5 + $0x148] sm:$0xff]   ;;  %v258_v59 = vpack.c.bf16 %v244_v49, %v244_v49 }
  0x65   : > { %966 = vmatpush3.bf16.msra.mxu1 %v1090_v15  ;;  %v1120_v54 = vld [vmem:[#allocation5 + $0x110] sm:$0xff]   ;;  %v1122_v56 = vld [vmem:[#allocation5 + $0x108] sm:$0xff]   ;;  %v1123_v57 = vld [vmem:[#allocation5 + $0x140] sm:$0xff]  }
  0x66   : > { %967 = vmatprep.subr.bf16.mxu1 %v1093_v18  ;;  %677 = vmatprep.mubr.bf16.mxu0 %v255_v37  ;;  %v259_v53 = vpack.c.bf16 %v250_v50, %v250_v50  ;;  %v1124_v58 = vld [vmem:[#allocation5 + $0x100] sm:$0xff]   ;;  %v356_v5 = vld [vmem:[%s1490_s3] sm:$0xf] }
  0x67   : > { %946 = vmatpush3.bf16.msra.mxu0 %v1092_v17  ;;  %v765_v14 = vld [vmem:[#allocation7] sm:$0xf] }
  0x68   : > { %947 = vmatprep.subr.bf16.mxu0 %v1095_v20 }
  0x69   : > { %968 = vmatpush3.bf16.msra.mxu1 %v1094_v19 }
  0x6a   : > { %969 = vmatprep.subr.bf16.mxu1 %v1097_v22 }
  0x6b   : > { %948 = vmatpush3.bf16.msra.mxu0 %v1096_v21 }
  0x6c   : > { %949 = vmatprep.subr.bf16.mxu0 %v1099_v24 }
  0x6d   : > { %970 = vmatpush3.bf16.msra.mxu1 %v1098_v23 }
  0x6e   : > { %971 = vmatprep.subr.bf16.mxu1 %v1101_v26 }
  0x6f   : > { %950 = vmatpush3.bf16.msra.mxu0 %v1100_v25 }
  0x70   : > { %951 = vmatprep.subr.bf16.mxu0 %v1103_v28 }
  0x71   : > { %972 = vmatpush3.bf16.msra.mxu1 %v1102_v27 }
  0x72   : > { %973 = vmatprep.subr.bf16.mxu1 %v1105_v30 }
  0x73   : > { %952 = vmatpush3.bf16.msra.mxu0 %v1104_v29 }
  0x74   : > { %981 = vmatprep.subr.bf16.mxu0 %v1108_v35 }
  0x75   : > { %974 = vmatpush3.bf16.msra.mxu1 %v1107_v33 }
  0x76   : > { %678 = vmatmul.mubr.bf16.vlgmr.msra.gmra.mxu0 %v254_v34 }
  0x77   : > { %982 = vmatpush3.bf16.msra.mxu0 %v1110_v39  ;;  %757 = vmatprep.mubr.bf16.mxu0 %v259_v53 }
  0x78   : > { %718 = vmatmul.mubr.bf16.vlgmr.msra.gmra.mxu1 %v256_v40  ;;  %983 = vmatprep.subr.bf16.mxu0 %v1111_v41 }
  0x7b   : > { %984 = vmatpush3.bf16.msra.mxu0 %v1112_v43 }
  0x7c   : > { %985 = vmatprep.subr.bf16.mxu0 %v1113_v44 }
  0x7f   : > { %986 = vmatpush3.bf16.msra.mxu0 %v1114_v45 }
  0x80   : > { %987 = vmatprep.subr.bf16.mxu0 %v1115_v46 }
  0x83   : > { %988 = vmatpush3.bf16.msra.mxu0 %v1116_v47 }
  0x84   : > { %989 = vmatprep.subr.bf16.mxu0 %v1117_v48 }
  0x87   : > { %990 = vmatpush3.bf16.msra.mxu0 %v1118_v51 }
  0x88   : > { %991 = vmatprep.subr.bf16.mxu0 %v1119_v52 }
  0x8b   : > { %992 = vmatpush3.bf16.msra.mxu0 %v1120_v54 }
  0x8c   : > { %993 = vmatprep.subr.bf16.mxu0 %v1121_v55 }
  0x8f   : > { %994 = vmatpush3.bf16.msra.mxu0 %v1122_v56 }
  0x90   : > { %995 = vmatprep.subr.bf16.mxu0 %v1123_v57 }
  0x93   : > { %996 = vmatpush3.bf16.msra.mxu0 %v1124_v58 }
  0x96   : > { %758 = vmatmul.mubr.bf16.vlgmr.msra.gmra.mxu0 %v258_v59 }
 0x136   : > { %v953_v60 = vpop.f32.mrf.mxu0 }
 0x138   : > { %v954_v61 = vpop.f32.mrf.mxu0  ;;  %v975_v62 = vpop.f32.mrf.mxu1 }
 0x139   : > { %v955_v4 = vadd.f32 %v954_v61, %v953_v60 }
 0x13a   : > { %v956_v63 = vpop.f32.mrf.mxu0  ;;  %v976_v0 = vpop.f32.mrf.mxu1 }
 0x13b   : > { %v680_v6 = vadd.f32 %v955_v4, %v356_v5  ;;  %v977_v7 = vadd.f32 %v976_v0, %v975_v62 }
 0x13c   : > { %v957_v1 = vpop.f32.mrf.mxu0  ;;  %v978_v2 = vpop.f32.mrf.mxu1 }
 0x13d   : > { %v720_v10 = vadd.f32 %v977_v7, %v680_v6 }
 0x13e   : > { %v979_v3 = vpop.f32.mrf.mxu1 }
 0x156   : > { %v997_v8 = vpop.f32.mrf.mxu0 }
 0x158   : > { %v998_v9 = vpop.f32.mrf.mxu0 }
 0x159   : > { %v999_v11 = vadd.f32 %v998_v9, %v997_v8 }
 0x15a   : > { %v1000_v12 = vpop.f32.mrf.mxu0 }
 0x15b   : > { %v760_v13 = vadd.f32 %v999_v11, %v720_v10 }
 0x15c   : > { %v1001_v15 = vpop.f32.mrf.mxu0 }
 0x15d   : > { %v767_v16 = vrot.slane %v760_v13, 4 }
 0x15f   : > { %v770_v17 = vsel %vm769_vm0, %v765_v14, %v767_v16 }
 0x160   : > { %771 = vst [vmem:[%s240_s6] sm:$0xff] %v770_v17 }
 0x161   : > { %1219 = shalt.err (!%p1216_p9)
}
 0x162   : > { %s1220_s8 = scalar_lea.hbm %s1450_s26, 128  ;;  %s1224_s10 = scalar_lea.hbm %s1491_s4, 256 }
 0x163   : > { %p1221_p13 = scmp.ne.s32.totalorder %s1450_s26, %s1220_s8  ;;  %p1225_p0 = scmp.lt.s32.totalorder %s1450_s26, %s1491_s4 }
 0x164   : > { %p1226_p4 = scmp.lt.s32.totalorder %s1224_s10, %s1220_s8 }
 0x165   : > { %p1222_p5 = pnand %p1221_p13, %p1507_p11 }
 0x166   : > { %p1227_p8 = por %p1226_p4, %p1225_p0 }
 0x167   : > { %p1223_p10 = pneg %p1222_p5 }
 0x169   : > { %p1228_p3 = pnand %p1227_p8, %p1223_p10 }
 0x16b   : > { %1231 = shalt.err (!%p1228_p3)
}
 0x16c   : > { %1016 = dma.vmem_to_hbm [thread:$0]  (%p1507_p11), %s787_s7, 128, %s1450_s26, %s773_s25  }
 0x16d PF: > { %s798_s27 = sand.u32 1, %s1262_s15   ;;  %p1508_p1 = scmp.ne.s32.totalorder %s1497_s22, 0 }
 0x16e   : > { %p1509_p2 = scmp.ge.s32.totalorder %s1274_s18, 2  ;;  %s799_s30 = scalar_lea.sflag [#allocation4], %s798_s27 }
 0x170   : > { %p1030_p6 = pnand %p1509_p2, %p1508_p1 }
 0x172   : > { %p1031_p12 = pneg %p1030_p6 }
 0x174   : > { %1257 = dma.done.wait (%p1031_p12), %s799_s30, 128  }
 0x175   : > { %1259 = vsyncadd (%p1031_p12), %s799_s30, 4294967168  ;;  %p18_p7 = scmp.ge.s32.totalorder %s1379_s11, 4   ;;  %s1510_s15 = smov %s1266_s16 }
 0x176   : > { %s1511_s16 = smov %s1270_s17  ;;  %s1512_s17 = smov %s1395_s20 }
 0x177   : > { %s1513_s18 = smov %s1379_s11  ;;  %20 = sbr.rel (!%p18_p7) target bundleno = 6 (0x6), region = 89 }
 0x17c   :  { %804 = vsyncpa [#allocation3], 1 }
 0x17d   :  { %806 = vsyncpa [#allocation3 + $0x1], 1 }
 0x17e   :  { %807 = vsyncpa [#allocation6], 1 }
 0x17f   :  { %808 = vsyncpa [#allocation4], 1 }
 0x180   :  { %810 = vsyncpa [#allocation4 + $0x1], 1 }

</bundles_post_ra>
